<compile_context>
chip_gen: v6e
topology: v6e:2x2x1
jax: 0.10.0
libtpu: 0.0.40
codegen_flags: <defaults>
</compile_context>

<pallas_src>
import functools

import jax
import jax.numpy as jnp
from jax import lax
from jax.experimental import pallas as pl
from jax.experimental.pallas import tpu as pltpu


def _bpmll_kernel(c_ref, y_ref, out_ref, pos_acc, neg_acc, ysum_acc, *,
                  bias, batch, labels, block_rows, block_cols):
    b = pl.program_id(0)
    l = pl.program_id(1)
    nl = pl.num_programs(1)

    @pl.when(l == 0)
    def _():
        pos_acc[...] = jnp.zeros_like(pos_acc)
        neg_acc[...] = jnp.zeros_like(neg_acc)
        ysum_acc[...] = jnp.zeros_like(ysum_acc)

    x = c_ref[...].astype(jnp.float32)          # (TB, TL)
    y = y_ref[...].astype(jnp.float32)          # (TB, TL)

    # Sigmoid via a single transcendental (tanh on the EUP), then one exp and
    # an approx reciprocal instead of a second exp: 3 EUP pushes per element.
    c = 0.5 * jnp.tanh(0.5 * x) + 0.5           # sigmoid(x), c in [0, 1]
    e = jnp.exp(c)                              # exp(c) in [1, e]
    e_inv = pl.reciprocal(e, approx=True)       # exp(-c), ~2^-12 rel error

    pos = y * e_inv                             # y_k * exp(-c_k)
    neg = (1.0 - y) * e                         # ybar_l * exp(c_l)
    ys = y

    if labels % block_cols != 0:
        # Partial last label block: mask garbage lanes (mask *after* the
        # multiply so NaN/inf garbage can never propagate).
        col = l * block_cols + lax.broadcasted_iota(
            jnp.int32, (block_rows, block_cols), 1)
        col_ok = col < labels
        pos = jnp.where(col_ok, pos, 0.0)
        neg = jnp.where(col_ok, neg, 0.0)
        ys = jnp.where(col_ok, ys, 0.0)

    pos_acc[...] += jnp.sum(pos, axis=-1, keepdims=True)
    neg_acc[...] += jnp.sum(neg, axis=-1, keepdims=True)
    ysum_acc[...] += jnp.sum(ys, axis=-1, keepdims=True)

    @pl.when(l == nl - 1)
    def _():
        pair = pos_acc[...] * neg_acc[...]                  # (TB, 1)
        y_norm = ysum_acc[...]
        y_bar_norm = float(labels) - y_norm                 # sum(1-y) == L - sum(y)
        # bias is a static Python tuple: skip the pow when it is 1.
        if bias[0] != 1:
            y_norm = y_norm ** bias[0]
        if bias[1] != 1:
            y_bar_norm = y_bar_norm ** bias[1]
        denom = y_norm * y_bar_norm

        if batch % block_rows != 0:
            # Partial last batch block: zero padding rows (garbage-safe).
            row = b * block_rows + lax.broadcasted_iota(
                jnp.int32, (block_rows, 1), 0)
            row_ok = row < batch
            denom_safe = jnp.where(row_ok, denom, 1.0)
            term = jnp.where(row_ok, pair / denom_safe, 0.0)
        else:
            term = pair / denom

        out_ref[0, 0] = jnp.sum(term)


def _round_up(x, m):
    return (x + m - 1) // m * m


def bpmll_loss(c, y, bias=(1, 1), *, vmem_budget_bytes=12 * 1024 * 1024):
    """BPMLL loss: scalar, matching BPMLLLoss(bias).forward(c, y).

    `c` / `y` may be bf16 (or integer labels); they are consumed as-is and
    up-cast to f32 inside the kernel — do not pre-cast to f32 (this kernel is
    HBM-bound on v5e/v6e).
    """
    assert len(bias) == 2 and all(isinstance(x, int) and x > 0 for x in bias), \
        "bias must be positive integers"
    # TODO(synk): the PyTorch data-dependent assert ("an instance cannot have
    # none or all the labels") is a host-side runtime check and is not
    # reproduced inside the kernel (such rows yield inf/nan, as torch would
    # without the assert).
    B, L = c.shape
    assert y.shape == (B, L)

    bytes_pair = jnp.dtype(c.dtype).itemsize + jnp.dtype(y.dtype).itemsize

    # Label (lane) tile: keep the whole label dim in one block if 8 rows of
    # double-buffered inputs fit the budget; otherwise tile L in multiples of
    # 128 (accumulated across the trailing "arbitrary" grid axis).
    if 2 * 8 * L * bytes_pair <= vmem_budget_bytes:
        tl = L
    else:
        tl = max(128, (vmem_budget_bytes // (2 * 8 * bytes_pair)) // 128 * 128)
    nl = pl.cdiv(L, tl)

    # Batch (sublane) tile: as large as fits the budget, counting the
    # double-buffered inputs plus the three (TB,1) f32 accumulators (which pad
    # to (TB,128) in VMEM). Budget < v5e's 16 MiB scoped-VMEM default.
    per_row_bytes = 2 * tl * bytes_pair + 3 * 128 * 4
    tb_cap = max(8, (vmem_budget_bytes // per_row_bytes) // 8 * 8)
    if B <= 8:
        tb = B                                   # single block, full batch dim
    else:
        # >= 2 batch blocks so the "parallel" axis spans both v7x TensorCores.
        tb = max(8, min(tb_cap, 4096, _round_up(pl.cdiv(B, 2), 8)))
    nb = pl.cdiv(B, tb)

    kernel = functools.partial(
        _bpmll_kernel, bias=tuple(bias), batch=B, labels=L,
        block_rows=tb, block_cols=tl)

    partials = pl.pallas_call(
        kernel,
        out_shape=jax.ShapeDtypeStruct((nb, 1), jnp.float32),
        grid_spec=pltpu.PrefetchScalarGridSpec(
            num_scalar_prefetch=0,
            grid=(nb, nl),
            in_specs=[
                pl.BlockSpec((tb, tl), lambda b, l: (b, l)),
                pl.BlockSpec((tb, tl), lambda b, l: (b, l)),
            ],
            out_specs=pl.BlockSpec((1, 1), lambda b, l: (b, 0),
                                   memory_space=pltpu.SMEM),
            scratch_shapes=[
                pltpu.VMEM((tb, 1), jnp.float32),   # sum_k y_k exp(-c_k)
                pltpu.VMEM((tb, 1), jnp.float32),   # sum_l ybar_l exp(c_l)
                pltpu.VMEM((tb, 1), jnp.float32),   # sum_k y_k
            ],
        ),
        compiler_params=pltpu.CompilerParams(
            dimension_semantics=("parallel", "arbitrary")),
    )(c, y)

    return jnp.sum(partials) / jnp.float32(B)


def _reference(c, y, bias=(1, 1)):
    """Pure-JAX mirror of the PyTorch forward (for verification)."""
    cs = jax.nn.sigmoid(c.astype(jnp.float32))
    y = y.astype(jnp.float32)
    y_bar = 1.0 - y
    truth = y[:, :, None] * y_bar[:, None, :]
    expm = jnp.exp(cs[:, None, :] - cs[:, :, None])
    pair = jnp.sum(truth * expm, axis=(1, 2))
    y_norm = jnp.sum(y, axis=1) ** bias[0]
    y_bar_norm = jnp.sum(y_bar, axis=1) ** bias[1]
    return jnp.mean(pair / (y_norm * y_bar_norm))


if __name__ == "__main__":
    key = jax.random.PRNGKey(0)

    # (B, L, bias, dtype, forced_vmem_budget_or_None)
    cases = (
        (8, 128, (1, 1), jnp.float32, None),          # single block
        (10, 128, (2, 1), jnp.float32, None),         # partial batch block
        (32, 256, (1, 1), jnp.float32, None),         # 2 full batch blocks
        (12, 384, (1, 2), jnp.bfloat16, 16 * 1024),   # bf16 + L-tiling + masks
    )

    ok = True
    for (B, L, bias, dtype, budget) in cases:
        kc, ky, key = jax.random.split(key, 3)
        c = jax.random.normal(kc, (B, L)).astype(dtype)
        y = (jax.random.uniform(ky, (B, L)) > 0.5).astype(dtype)
        # Guarantee every instance has at least one positive and one negative
        # label (the module asserts this precondition).
        y = y.at[:, 0].set(1).at[:, 1].set(0)

        if budget is None:
            loss = bpmll_loss(c, y, bias=bias)
        else:
            loss = bpmll_loss(c, y, bias=bias, vmem_budget_bytes=budget)
        loss = jax.block_until_ready(loss)

        expected = _reference(c, y, bias=bias)
        ok &= bool(jnp.isfinite(loss))
        # approx reciprocal (~2^-12 rel) -> relaxed tolerance vs the exact ref
        ok &= bool(jnp.allclose(loss, expected, rtol=2e-3, atol=1e-5))
        assert ok, (B, L, bias, dtype, loss, expected)

    print("KERNEL_OK")
</pallas_src>

<mosaic_0001>
module attributes {stable_mosaic.version = 11 : i64} {
  func.func @_bpmll_kernel(%arg0: i32, %arg1: i32, %arg2: memref<8x128xf32, #tpu.memory_space<vmem>>, %arg3: memref<8x128xf32, #tpu.memory_space<vmem>>, %arg4: memref<1x1xf32, #tpu.memory_space<smem>>, %arg5: memref<8x1xf32, #tpu.memory_space<vmem>>, %arg6: memref<8x1xf32, #tpu.memory_space<vmem>>, %arg7: memref<8x1xf32, #tpu.memory_space<vmem>>) attributes {dimension_semantics = [#tpu.dimension_semantics<parallel>, #tpu.dimension_semantics<arbitrary>], iteration_bounds = array<i64: 1, 1>, scalar_prefetch = 0 : i64, scratch_operands = 3 : i64, tpu.core_type = #tpu.core_type<tc>, window_params = [{transform_indices = @transform_0, window_bounds = array<i64: 8, 128>}, {transform_indices = @transform_1, window_bounds = array<i64: 8, 128>}, {transform_indices = @transform_2, window_bounds = array<i64: 1, 1>}]} {
    %c0_i32 = arith.constant 0 : i32
    %0 = arith.cmpi eq, %arg1, %c0_i32 : i32
    %1 = arith.extui %0 : i1 to i32
    %c0_i32_0 = arith.constant 0 : i32
    %2 = arith.cmpi ne, %1, %c0_i32_0 : i32
    scf.if %2 {
      %cst_24 = arith.constant 0.000000e+00 : f32
      %36 = vector.broadcast %cst_24 : f32 to vector<8x1xf32>
      %c0_25 = arith.constant 0 : index
      %c0_26 = arith.constant 0 : index
      %37 = vector.load %arg5[%c0_25, %c0_26] : memref<8x1xf32, #tpu.memory_space<vmem>>, vector<8x1xf32>
      tpu.vector_store %arg5[%c0_25, %c0_26], %36 {strides = array<i32>} : memref<8x1xf32, #tpu.memory_space<vmem>>, vector<8x1xf32>,
      %cst_27 = arith.constant 0.000000e+00 : f32
      %38 = vector.broadcast %cst_27 : f32 to vector<8x1xf32>
      %c0_28 = arith.constant 0 : index
      %c0_29 = arith.constant 0 : index
      %39 = vector.load %arg6[%c0_28, %c0_29] : memref<8x1xf32, #tpu.memory_space<vmem>>, vector<8x1xf32>
      tpu.vector_store %arg6[%c0_28, %c0_29], %38 {strides = array<i32>} : memref<8x1xf32, #tpu.memory_space<vmem>>, vector<8x1xf32>,
      %cst_30 = arith.constant 0.000000e+00 : f32
      %40 = vector.broadcast %cst_30 : f32 to vector<8x1xf32>
      %c0_31 = arith.constant 0 : index
      %c0_32 = arith.constant 0 : index
      %41 = vector.load %arg7[%c0_31, %c0_32] : memref<8x1xf32, #tpu.memory_space<vmem>>, vector<8x1xf32>
      tpu.vector_store %arg7[%c0_31, %c0_32], %40 {strides = array<i32>} : memref<8x1xf32, #tpu.memory_space<vmem>>, vector<8x1xf32>,
    } else {
    }
    %c0 = arith.constant 0 : index
    %c0_1 = arith.constant 0 : index
    %3 = vector.load %arg2[%c0, %c0_1] : memref<8x128xf32, #tpu.memory_space<vmem>>, vector<8x128xf32>
    %c0_2 = arith.constant 0 : index
    %c0_3 = arith.constant 0 : index
    %4 = vector.load %arg3[%c0_2, %c0_3] : memref<8x128xf32, #tpu.memory_space<vmem>>, vector<8x128xf32>
    %cst = arith.constant 5.000000e-01 : f32
    %5 = vector.broadcast %cst : f32 to vector<8x128xf32>
    %6 = arith.mulf %5, %3 : vector<8x128xf32>
    %7 = math.tanh %6 : vector<8x128xf32>
    %cst_4 = arith.constant 5.000000e-01 : f32
    %8 = vector.broadcast %cst_4 : f32 to vector<8x128xf32>
    %9 = arith.mulf %8, %7 : vector<8x128xf32>
    %cst_5 = arith.constant 5.000000e-01 : f32
    %10 = vector.broadcast %cst_5 : f32 to vector<8x128xf32>
    %11 = arith.addf %9, %10 : vector<8x128xf32>
    %12 = math.exp %11 : vector<8x128xf32>
    %13 = tpu.reciprocal %12 {approx = true} : vector<8x128xf32> -> vector<8x128xf32>
    %14 = arith.mulf %4, %13 : vector<8x128xf32>
    %cst_6 = arith.constant 1.000000e+00 : f32
    %15 = vector.broadcast %cst_6 : f32 to vector<8x128xf32>
    %16 = arith.subf %15, %4 : vector<8x128xf32>
    %17 = arith.mulf %16, %12 : vector<8x128xf32>
    %c0_7 = arith.constant 0 : index
    %c0_8 = arith.constant 0 : index
    %18 = vector.load %arg5[%c0_7, %c0_8] : memref<8x1xf32, #tpu.memory_space<vmem>>, vector<8x1xf32>
    %cst_9 = arith.constant dense<0.000000e+00> : vector<8xf32>
    %19 = vector.multi_reduction <add>, %14, %cst_9 [1] : vector<8x128xf32> to vector<8xf32>
    %20 = vector.shape_cast %19 : vector<8xf32> to vector<8x1xf32>
    %21 = arith.addf %18, %20 : vector<8x1xf32>
    %c0_10 = arith.constant 0 : index
    %c0_11 = arith.constant 0 : index
    %22 = vector.load %arg5[%c0_10, %c0_11] : memref<8x1xf32, #tpu.memory_space<vmem>>, vector<8x1xf32>
    tpu.vector_store %arg5[%c0_10, %c0_11], %21 {strides = array<i32>} : memref<8x1xf32, #tpu.memory_space<vmem>>, vector<8x1xf32>,
    %c0_12 = arith.constant 0 : index
    %c0_13 = arith.constant 0 : index
    %23 = vector.load %arg6[%c0_12, %c0_13] : memref<8x1xf32, #tpu.memory_space<vmem>>, vector<8x1xf32>
    %cst_14 = arith.constant dense<0.000000e+00> : vector<8xf32>
    %24 = vector.multi_reduction <add>, %17, %cst_14 [1] : vector<8x128xf32> to vector<8xf32>
    %25 = vector.shape_cast %24 : vector<8xf32> to vector<8x1xf32>
    %26 = arith.addf %23, %25 : vector<8x1xf32>
    %c0_15 = arith.constant 0 : index
    %c0_16 = arith.constant 0 : index
    %27 = vector.load %arg6[%c0_15, %c0_16] : memref<8x1xf32, #tpu.memory_space<vmem>>, vector<8x1xf32>
    tpu.vector_store %arg6[%c0_15, %c0_16], %26 {strides = array<i32>} : memref<8x1xf32, #tpu.memory_space<vmem>>, vector<8x1xf32>,
    %c0_17 = arith.constant 0 : index
    %c0_18 = arith.constant 0 : index
    %28 = vector.load %arg7[%c0_17, %c0_18] : memref<8x1xf32, #tpu.memory_space<vmem>>, vector<8x1xf32>
    %cst_19 = arith.constant dense<0.000000e+00> : vector<8xf32>
    %29 = vector.multi_reduction <add>, %4, %cst_19 [1] : vector<8x128xf32> to vector<8xf32>
    %30 = vector.shape_cast %29 : vector<8xf32> to vector<8x1xf32>
    %31 = arith.addf %28, %30 : vector<8x1xf32>
    %c0_20 = arith.constant 0 : index
    %c0_21 = arith.constant 0 : index
    %32 = vector.load %arg7[%c0_20, %c0_21] : memref<8x1xf32, #tpu.memory_space<vmem>>, vector<8x1xf32>
    tpu.vector_store %arg7[%c0_20, %c0_21], %31 {strides = array<i32>} : memref<8x1xf32, #tpu.memory_space<vmem>>, vector<8x1xf32>,
    %c0_i32_22 = arith.constant 0 : i32
    %33 = arith.cmpi eq, %arg1, %c0_i32_22 : i32
    %34 = arith.extui %33 : i1 to i32
    %c0_i32_23 = arith.constant 0 : i32
    %35 = arith.cmpi ne, %34, %c0_i32_23 : i32
    scf.if %35 {
      %c0_24 = arith.constant 0 : index
      %c0_25 = arith.constant 0 : index
      %36 = vector.load %arg5[%c0_24, %c0_25] : memref<8x1xf32, #tpu.memory_space<vmem>>, vector<8x1xf32>
      %c0_26 = arith.constant 0 : index
      %c0_27 = arith.constant 0 : index
      %37 = vector.load %arg6[%c0_26, %c0_27] : memref<8x1xf32, #tpu.memory_space<vmem>>, vector<8x1xf32>
      %38 = arith.mulf %36, %37 : vector<8x1xf32>
      %c0_28 = arith.constant 0 : index
      %c0_29 = arith.constant 0 : index
      %39 = vector.load %arg7[%c0_28, %c0_29] : memref<8x1xf32, #tpu.memory_space<vmem>>, vector<8x1xf32>
      %cst_30 = arith.constant 1.280000e+02 : f32
      %40 = vector.broadcast %cst_30 : f32 to vector<8x1xf32>
      %41 = arith.subf %40, %39 : vector<8x1xf32>
      %42 = arith.mulf %39, %41 : vector<8x1xf32>
      %43 = arith.divf %38, %42 : vector<8x1xf32>
      %44 = vector.shape_cast %43 : vector<8x1xf32> to vector<1x8x1xf32>
      %cst_31 = arith.constant dense<0.000000e+00> : vector<1xf32>
      %45 = vector.multi_reduction <add>, %44, %cst_31 [1, 2] : vector<1x8x1xf32> to vector<1xf32>
      %46 = vector.shape_cast %45 : vector<1xf32> to vector<1x1x1xf32>
      %47 = vector.extract %46[0, 0, 0] : f32 from vector<1x1x1xf32>
      %c0_32 = arith.constant 0 : index
      %c0_33 = arith.constant 0 : index
      %48 = memref.load %arg4[%c0_32, %c0_33] : memref<1x1xf32, #tpu.memory_space<smem>>
      memref.store %47, %arg4[%c0_32, %c0_33] : memref<1x1xf32, #tpu.memory_space<smem>>
    } else {
    }
    return
  }
  func.func @transform_0(%arg0: i32, %arg1: i32) -> (i32, i32) {
    %c0_i32 = arith.constant 0 : i32
    return %arg0, %arg1 : i32, i32
  }
  func.func @transform_1(%arg0: i32, %arg1: i32) -> (i32, i32) {
    %c0_i32 = arith.constant 0 : i32
    return %arg0, %arg1 : i32, i32
  }
  func.func @transform_2(%arg0: i32, %arg1: i32) -> (i32, i32) {
    %c0_i32 = arith.constant 0 : i32
    %c0_i32_0 = arith.constant 0 : i32
    return %arg0, %c0_i32 : i32, i32
  }
}

</mosaic_0001>

<bundles_post_ra>
// kernel: tpu_custom_call.1
= control target key start
LH: loop header
LB: loop body
LE: loop exit
PB: predicated region body
PF: predicated region fallthrough
CT: control target
= control target key end

     0   :  { %7 = vsyncpa [#allocation6], 0  ;;  %s213_s0 = inlined_call_operand.hbm [shape: f32[8,128], index: 0, kind: input, shape index: {}]   ;;  %s214_s1 = inlined_call_operand.hbm [shape: f32[8,128], index: 1, kind: input, shape index: {}]   ;;  %s215_s2 = inlined_call_operand.hbm [shape: f32[1,1], index: 2, kind: output, shape index: {}]  }
   0x1   :  { %8 = vsyncpa [#allocation9], 0 }
   0x2   :  { %9 = vsyncpa [#allocation7], 0  ;;  %s178_s9 = smov [#allocation5]   ;;  %s179_s11 = smov [#allocation8]  }
   0x3   :  { %s16_s10 = sshll.u32 %s178_s9, 4  ;;  %s26_s12 = sshll.u32 %s179_s11, 4  ;;  %s17_s10 = int_to_ptr.vmem [resolvable:$true] %s16_s10  ;;  %s27_s12 = int_to_ptr.vmem [resolvable:$true] %s26_s12 }
   0x4   :  { %s132_s13 = scalar_lea.vmem %s17_s10, 128  ;;  %p137_p1 = scmp.lt.s32.totalorder %s17_s10, %s17_s10 }
   0x5   :  { %p133_p0 = scmp.ne.s32.totalorder %s17_s10, %s132_s13  ;;  %p138_p2 = scmp.lt.s32.totalorder %s132_s13, %s132_s13 }
   0x7   :  { %p139_p3 = por %p138_p2, %p137_p1 }
   0x9   :  { %p140_p4 = pnand %p139_p3, %p133_p0 }
   0xb   :  { %143 = shalt.err (!%p140_p4)
}
   0xc   :  { %19 = dma.hbm_to_vmem [thread:$0]  %s213_s0, 128, %s17_s10, [#allocation6]  }
   0xd   :  { %s152_s16 = scalar_lea.vmem %s27_s12, 128  ;;  %p157_p6 = scmp.lt.s32.totalorder %s27_s12, %s27_s12 }
   0xe   :  { %p153_p5 = scmp.ne.s32.totalorder %s27_s12, %s152_s16  ;;  %p158_p7 = scmp.lt.s32.totalorder %s152_s16, %s152_s16 }
  0x10   :  { %p159_p8 = por %p158_p7, %p157_p6 }
  0x12   :  { %p160_p9 = pnand %p159_p8, %p153_p5 }
  0x14   :  { %163 = shalt.err (!%p160_p9)
}
  0x15   :  { %29 = dma.hbm_to_vmem [thread:$0]  %s214_s1, 128, %s27_s12, [#allocation9]  }
  0x16   :  { %172 = dma.done.wait [#allocation6], 128  }
  0x17   :  { %173 = vsyncadd [#allocation6], 4294967168 }
  0x18   :  { %174 = dma.done.wait [#allocation9], 128  }
  0x19   :  { %175 = vsyncadd [#allocation9], 4294967168  ;;  %vm40_vm0 = vcmask 7168   ;;  %v180_v0 = vmov 0.0   ;;  %v45_v1 = vld [vmem:[#allocation8] sm:$0xff]  ;;  %v44_v2 = vld [vmem:[#allocation5] sm:$0xff] }
  0x1a   :  { %43 = vst.msk [vmem:[#allocation4] sm:$0xff] %vm40_vm0, %v180_v0  ;;  %41 = vst.msk [vmem:[#allocation2] sm:$0xff] %vm40_vm0, %v180_v0  ;;  %68 = vadd.xlane.f32.xlu0 %v45_v1  ;;  %v46_v3 = vmul.f32 0.5, %v44_v2  ;;  %v54_v8 = vsub.f32 1.0, %v45_v1  ;;  %s181_s1 = smov [#allocation10]  }
  0x1b   :  { %42 = vst.msk [vmem:[#allocation3] sm:$0xff] %vm40_vm0, %v180_v0 }
  0x1c   :  { %116 = vtanh.f32 %v46_v3 }
  0x21   :  { %v67_v13 = vld [vmem:[#allocation4] sm:$0xff]  ;;  %v56_v22 = vld [vmem:[#allocation2] sm:$0xff] }
  0x22   :  { %v62_v16 = vld [vmem:[#allocation3] sm:$0xff] }
  0x29   :  { %v117_v4 = vpop.eup %116 }
  0x2a   :  { %v48_v5 = vmul.f32 0.5, %v117_v4 }
  0x2c   :  { %v49_v6 = vadd.f32 0.5, %v48_v5 }
  0x2e   :  { %v50_v7 = vmul.f32 1.442695, %v49_v6 }
  0x30   :  { %118 = vpow2.f32 %v50_v7 }
  0x3d   :  { %v119_v9 = vpop.eup %118 }
  0x3e   :  { %v55_v10 = vmul.f32 %v119_v9, %v54_v8  ;;  %120 = vrcp.f32 %v119_v9 }
  0x40   :  { %63 = vadd.xlane.f32.xlu1 %v55_v10 }
  0x4b   :  { %v121_v11 = vpop.eup %120 }
  0x4c   :  { %v53_v12 = vmul.f32 %v121_v11, %v45_v1 }
  0x4e   :  { %57 = vadd.xlane.f32.xlu0 %v53_v12 }
  0xa3   :  { %v69_v14 = vpop.xlane.xlu0 %68 }
  0xa4   :  { %v70_v15 = vadd.f32 %v69_v14, %v67_v13 }
  0xa6   :  { %71 = vst.msk [vmem:[#allocation4] sm:$0xff] %vm40_vm0, %v70_v15 }
  0xad   :  { %v78_v19 = vld [vmem:[#allocation4] sm:$0xff] }
  0xae   :  { %v79_v20 = vsub.f32 128.0, %v78_v19 }
  0xb0   :  { %v80_v21 = vmul.f32 %v79_v20, %v78_v19 }
  0xb2   :  { %122 = vrcp.f32 %v80_v21 }
  0xbf   :  { %v123_v28 = vpop.eup %122 }
  0xc9   :  { %v64_v17 = vpop.xlane.xlu1 %63 }
  0xca   :  { %v65_v18 = vadd.f32 %v64_v17, %v62_v16 }
  0xcc   :  { %66 = vst.msk [vmem:[#allocation3] sm:$0xff] %vm40_vm0, %v65_v18 }
  0xd3   :  { %v76_v25 = vld [vmem:[#allocation3] sm:$0xff] }
  0xd7   :  { %v58_v23 = vpop.xlane.xlu0 %57 }
  0xd8   :  { %v59_v24 = vadd.f32 %v58_v23, %v56_v22 }
  0xda   :  { %61 = vst.msk [vmem:[#allocation2] sm:$0xff] %vm40_vm0, %v59_v24 }
  0xe1   :  { %v75_v26 = vld [vmem:[#allocation2] sm:$0xff] }
  0xe2   :  { %v77_v27 = vmul.f32 %v76_v25, %v75_v26 }
  0xe4   :  { %v82_v29 = vmul.f32 %v123_v28, %v77_v27 }
  0xe6   :  { %v83_v30 = vsel %vm40_vm0, %v82_v29, 0.0 }
  0xe7   :  { %84 = vadd.xlane.f32.xlu1 %v83_v30 }
 0x170   :  { %v85_v31 = vpop.xlane.xlu1 %84 }
 0x171   :  { %v86_v32 = vrot.slane %v85_v31, 4 }
 0x173   :  { %v87_v33 = vadd.f32 %v86_v32, %v85_v31 }
 0x175   :  { %v88_v34 = vrot.slane %v87_v33, 2 }
 0x177   :  { %v89_v35 = vadd.f32 %v88_v34, %v87_v33 }
 0x179   :  { %v90_v36 = vrot.slane %v89_v35, 1 }
 0x17b   :  { %v91_v37 = vadd.f32 %v90_v36, %v89_v35 }
 0x17d   :  { %110 = vpush %v91_v37 }
 0x1ae   :  { %s111_s0 = spop %110 }
 0x1af   :  { %94 = sst [smem:[#allocation10]] %s111_s0 }
 0x1b0   :  { %102 = dma.smem_to_hbm %s181_s1, 16, %s215_s2, [#allocation7]  }
 0x1b1   :  { %176 = dma.done.wait [#allocation7], 16  }
 0x1b2   :  { %177 = vsyncadd [#allocation7], 4294967280 }
 0x1b3   :  { %106 = sfence }
 0x1b4   :  { %107 = vsyncpa [#allocation6], 1 }
 0x1b5   :  { %108 = vsyncpa [#allocation9], 1 }
 0x1b6   :  { %109 = vsyncpa [#allocation7], 1 }

</bundles_post_ra>
